<compile_context>
chip_gen: v7x
topology: tpu7x:2x2x1
jax: 0.10.0
libtpu: 0.0.40
codegen_flags: <defaults>
</compile_context>

<pallas_src>
import functools

import jax
import jax.numpy as jnp
from jax.experimental import pallas as pl
from jax.experimental.pallas import tpu as pltpu

_LN_EPS = 1e-5


def _layernorm_f32(y, eps):
    mean = jnp.mean(y, axis=-1, keepdims=True)
    cen = y - mean
    var = jnp.mean(cen * cen, axis=-1, keepdims=True)
    return cen * jax.lax.rsqrt(var + eps)


# --------------- Path A: weights fully resident in VMEM (Buffered(1)) --------

def _ffn_resident_kernel(x_ref, w1_ref, w2_ref, o_ref, acc_ref, *,
                         h_chunk, n_chunks, eps):
    x = x_ref[...].astype(jnp.float32)           # [TM, E] residual / LN in f32
    xm = x_ref[...].astype(w1_ref.dtype)         # MXU input dtype (f32 or bf16)
    acc_ref[...] = jnp.zeros_like(acc_ref)

    def body(c, carry):
        c0 = pl.multiple_of(c * h_chunk, h_chunk)
        h = jnp.dot(xm, w1_ref[:, pl.ds(c0, h_chunk)],
                    preferred_element_type=jnp.float32)
        h = jnp.maximum(h, 0.0)                  # ReLU in f32
        acc_ref[...] += jnp.dot(h.astype(w2_ref.dtype),
                                w2_ref[pl.ds(c0, h_chunk), :],
                                preferred_element_type=jnp.float32)
        return carry

    jax.lax.fori_loop(0, n_chunks, body, 0, unroll=True)

    y = acc_ref[...] + x
    o_ref[...] = _layernorm_f32(y, eps).astype(o_ref.dtype)


# --------------- Path B: hidden dim streamed over a grid axis ----------------

def _ffn_streamed_kernel(x_ref, w1_ref, w2_ref, o_ref, acc_ref, *, eps):
    k = pl.program_id(1)

    @pl.when(k == 0)
    def _():
        acc_ref[...] = jnp.zeros_like(acc_ref)

    xm = x_ref[...].astype(w1_ref.dtype)
    h = jnp.dot(xm, w1_ref[...], preferred_element_type=jnp.float32)
    h = jnp.maximum(h, 0.0)
    acc_ref[...] += jnp.dot(h.astype(w2_ref.dtype), w2_ref[...],
                            preferred_element_type=jnp.float32)

    @pl.when(k == pl.num_programs(1) - 1)
    def _():
        y = acc_ref[...] + x_ref[...].astype(jnp.float32)
        o_ref[...] = _layernorm_f32(y, eps).astype(o_ref.dtype)


# --------------- sizing helpers ----------------------------------------------

def _vmem_caps():
    """(tile-sizing budget, vmem_limit_bytes) based on chip generation."""
    cap = None
    try:
        cap = int(pltpu.get_tpu_info().vmem_capacity_bytes)
    except Exception:
        cap = None
    if cap is not None and cap >= 100 * 1024 * 1024:
        # v5e / v6e: 128 MiB physical VMEM -> use most of it.
        return 96 * 1024 * 1024, 110 * 1024 * 1024
    # v7x (64 MiB per TensorCore; each core keeps its own weight copy) or
    # unknown: keep ~8-20 MiB headroom for Mosaic scratch + activation buffers.
    return 44 * 1024 * 1024, 56 * 1024 * 1024


def _choose_tm_resident(m, e, h, w_itemsize, x_itemsize, h_chunk, budget):
    """Largest row tile (multiple of 8) fitting the budget; None -> stream."""
    weight_bytes = w_itemsize * 2 * e * h                 # Buffered(1): 1 copy
    per_row = (2 * e * x_itemsize     # double-buffered x tile
               + 2 * e * 4            # double-buffered out tile
               + e * 4                # f32 accumulator scratch
               + 4 * min(h, h_chunk)) # one f32 hidden chunk
    avail = budget - weight_bytes
    if avail <= per_row * 8:
        return None
    tm = int(min(avail // per_row, 2048))
    tm -= tm % 8
    m8 = -(-m // 8) * 8
    return max(8, min(tm, m8))


def _choose_streamed_tiles(m, e, h, w_itemsize, x_itemsize, budget):
    """Pick (TM, TH) for the streamed path. TH divides H, lane-friendly."""
    def chunk_bytes(th):
        return 2 * w_itemsize * 2 * e * th                # double-buffered chunks
    cands = [d for d in range(h, 0, -1)
             if h % d == 0 and (d % 128 == 0 or d == h)]
    th = None
    for d in cands:
        if chunk_bytes(d) <= budget // 2:
            th = d
            break
    if th is None:
        th = cands[-1]
    per_row = 2 * e * x_itemsize + 2 * e * 4 + e * 4 + 4 * th
    avail = max(budget - chunk_bytes(th), per_row * 8)
    tm = int(min(avail // per_row, 1024))
    tm -= tm % 8
    tm = max(tm, 8)
    m8 = -(-m // 8) * 8
    return min(tm, m8), th


# --------------- public wrapper ----------------------------------------------

def feed_forward_net(x, w1, w2, *, tm=None, h_chunk=512, eps=_LN_EPS,
                     force_stream=False, stream_th=None):
    """x: [B, L, E] (any float dtype); w1: [E, H]; w2: [H, E] -> [B, L, E] f32.

    Weights are used in the dtype they are stored in (cast them to bf16 once at
    parameter setup for the fast MXU path on v5e/v6e/v7x); matmuls accumulate
    in f32 and ReLU / residual / LayerNorm always run in f32.
    """
    B, L, E = x.shape
    E1, H = w1.shape
    assert E1 == E and w2.shape == (H, E)
    M = B * L
    x2d = x.reshape(M, E)                          # native dtype, no extra pass

    wdt = jnp.dtype(w1.dtype)
    xdt = jnp.dtype(x.dtype)
    budget, vmem_limit = _vmem_caps()

    cost = pl.CostEstimate(
        flops=4 * M * E * H,                       # two matmuls, 2*M*E*H each
        transcendentals=M,                         # one rsqrt per row
        bytes_accessed=(xdt.itemsize + 4) * M * E + wdt.itemsize * 2 * E * H,
    )

    resident = (not force_stream) and (wdt.itemsize * 2 * E * H <= (budget * 6) // 10)
    if resident:
        hc = H if H <= h_chunk else max(d for d in range(1, h_chunk + 1) if H % d == 0)
        tm_r = tm
        if tm_r is None:
            tm_r = _choose_tm_resident(M, E, H, wdt.itemsize, xdt.itemsize, hc, budget)
            if tm_r is None:
                resident = False                   # weights too big -> stream

    if resident:
        tm_r = max(8, (int(tm_r) // 8) * 8)
        out2d = pl.pallas_call(
            functools.partial(_ffn_resident_kernel,
                              h_chunk=hc, n_chunks=H // hc, eps=eps),
            out_shape=jax.ShapeDtypeStruct((M, E), jnp.float32),
            grid_spec=pltpu.PrefetchScalarGridSpec(
                num_scalar_prefetch=0,
                grid=(pl.cdiv(M, tm_r),),          # partial last block, no pad
                in_specs=[
                    pl.BlockSpec((tm_r, E), lambda i: (i, 0)),
                    # Constant index_map -> fetched once; single buffer.
                    pl.BlockSpec((E, H), lambda i: (0, 0),
                                 pipeline_mode=pl.Buffered(1)),
                    pl.BlockSpec((H, E), lambda i: (0, 0),
                                 pipeline_mode=pl.Buffered(1)),
                ],
                out_specs=pl.BlockSpec((tm_r, E), lambda i: (i, 0)),
                scratch_shapes=[pltpu.VMEM((tm_r, E), jnp.float32)],
            ),
            compiler_params=pltpu.CompilerParams(
                dimension_semantics=("parallel",),   # shard row tiles on v7x
                vmem_limit_bytes=int(vmem_limit),
            ),
            cost_estimate=cost,
        )(x2d, w1, w2)
    else:
        tm_s, th = _choose_streamed_tiles(M, E, H, wdt.itemsize, xdt.itemsize, budget)
        if tm is not None:
            tm_s = max(8, (int(tm) // 8) * 8)
        if stream_th is not None:
            assert H % stream_th == 0 and (stream_th % 128 == 0 or stream_th == H)
            th = int(stream_th)
        out2d = pl.pallas_call(
            functools.partial(_ffn_streamed_kernel, eps=eps),
            out_shape=jax.ShapeDtypeStruct((M, E), jnp.float32),
            grid_spec=pltpu.PrefetchScalarGridSpec(
                num_scalar_prefetch=0,
                grid=(pl.cdiv(M, tm_s), H // th),
                in_specs=[
                    pl.BlockSpec((tm_s, E), lambda i, k: (i, 0)),
                    pl.BlockSpec((E, th), lambda i, k: (0, k)),
                    pl.BlockSpec((th, E), lambda i, k: (k, 0)),
                ],
                out_specs=pl.BlockSpec((tm_s, E), lambda i, k: (i, 0)),
                scratch_shapes=[pltpu.VMEM((tm_s, E), jnp.float32)],
            ),
            compiler_params=pltpu.CompilerParams(
                dimension_semantics=("parallel", "arbitrary"),
                vmem_limit_bytes=int(vmem_limit),
            ),
            cost_estimate=cost,
        )(x2d, w1, w2)

    return out2d.reshape(B, L, E)


def reference(x, w1, w2, eps=_LN_EPS):
    h = jnp.maximum(x @ w1, 0.0)
    y = h @ w2 + x
    mean = jnp.mean(y, axis=-1, keepdims=True)
    var = jnp.mean((y - mean) ** 2, axis=-1, keepdims=True)
    return (y - mean) * jax.lax.rsqrt(var + eps)


if __name__ == "__main__":
    key = jax.random.PRNGKey(0)
    k_x, k_w1, k_w2 = jax.random.split(key, 3)

    # Small, lane-friendly shapes: E, H multiples of 128 (dense stores, full MXU
    # contraction on v5e; on v6e/v7x prefer multiples of 256 when dims are
    # yours to pick).  M=96 with tm=64 -> 2 grid steps incl. a partial block.
    batch, length, embedding, hidden = 2, 48, 128, 256

    x = jax.random.normal(k_x, (batch, length, embedding), dtype=jnp.float32)
    # nn.Linear stores weight as [out, in] and computes x @ W.T; build the
    # transposed ([in, out]) matrices directly (bias=False in the module).
    bound1 = 1.0 / (embedding ** 0.5)
    bound2 = 1.0 / (hidden ** 0.5)
    w1 = jax.random.uniform(k_w1, (embedding, hidden), jnp.float32, -bound1, bound1)
    w2 = jax.random.uniform(k_w2, (hidden, embedding), jnp.float32, -bound2, bound2)

    ref = reference(x, w1, w2)

    # 1) Resident f32 path with a partial last row tile (no wrapper pad).
    out = jax.block_until_ready(feed_forward_net(x, w1, w2, tm=64))
    assert out.shape == (batch, length, embedding)
    assert jnp.allclose(out, ref, atol=1e-3, rtol=1e-3), "f32 resident mismatch"

    # 2) bf16-on-MXU path (valid on v5e/v6e/v7x): weights cast ONCE at setup,
    #    f32 accumulation, residual + LayerNorm in f32.  Relaxed tolerance.
    w1_bf16 = w1.astype(jnp.bfloat16)
    w2_bf16 = w2.astype(jnp.bfloat16)
    out_bf16 = jax.block_until_ready(feed_forward_net(x, w1_bf16, w2_bf16, tm=64))
    assert jnp.allclose(out_bf16, ref, atol=1e-1, rtol=1e-1), "bf16 resident mismatch"

    # 3) Streamed path (hidden dim on a grid axis with scratch accumulator),
    #    forced here at small shapes to exercise the large-E*H fallback.
    out_stream = jax.block_until_ready(
        feed_forward_net(x, w1, w2, tm=64, force_stream=True, stream_th=128))
    assert jnp.allclose(out_stream, ref, atol=1e-3, rtol=1e-3), "streamed mismatch"

    # 4) The module's original toy geometry (E=32, H=64): partially-masked
    #    lanes since E < 128 is fixed by the model, but still correct.
    b2, l2, e2, h2 = 2, 8, 32, 64
    x_s = jax.random.normal(k_x, (b2, l2, e2), dtype=jnp.float32)
    w1_s = jax.random.uniform(k_w1, (e2, h2), jnp.float32, -1 / e2 ** 0.5, 1 / e2 ** 0.5)
    w2_s = jax.random.uniform(k_w2, (h2, e2), jnp.float32, -1 / h2 ** 0.5, 1 / h2 ** 0.5)
    out_s = jax.block_until_ready(feed_forward_net(x_s, w1_s, w2_s, tm=8))
    assert jnp.allclose(out_s, reference(x_s, w1_s, w2_s), atol=1e-3, rtol=1e-3), \
        "small-shape mismatch"

    print("KERNEL_OK")
</pallas_src>

<mosaic_0001>
module attributes {stable_mosaic.version = 11 : i64} {
  func.func @_ffn_resident_kernel(%arg0: i32, %arg1: memref<64x128xf32, #tpu.memory_space<vmem>>, %arg2: memref<128x256xf32, #tpu.memory_space<vmem>>, %arg3: memref<256x128xf32, #tpu.memory_space<vmem>>, %arg4: memref<64x128xf32, #tpu.memory_space<vmem>>, %arg5: memref<64x128xf32, #tpu.memory_space<vmem>>) attributes {dimension_semantics = [#tpu.dimension_semantics<parallel>], iteration_bounds = array<i64: 2>, scalar_prefetch = 0 : i64, scratch_operands = 1 : i64, tpu.core_type = #tpu.core_type<tc>, window_params = [{transform_indices = @transform_0, window_bounds = array<i64: 64, 128>}, {pipeline_mode = #tpu.pipeline_mode<synchronous>, transform_indices = @transform_1, window_bounds = array<i64: 128, 256>}, {pipeline_mode = #tpu.pipeline_mode<synchronous>, transform_indices = @transform_2, window_bounds = array<i64: 256, 128>}, {transform_indices = @transform_3, window_bounds = array<i64: 64, 128>}]} {
    %c0 = arith.constant 0 : index
    %c0_0 = arith.constant 0 : index
    %0 = vector.load %arg1[%c0, %c0_0] : memref<64x128xf32, #tpu.memory_space<vmem>>, vector<64x128xf32>
    %c0_1 = arith.constant 0 : index
    %c0_2 = arith.constant 0 : index
    %1 = vector.load %arg1[%c0_1, %c0_2] : memref<64x128xf32, #tpu.memory_space<vmem>>, vector<64x128xf32>
    %cst = arith.constant 0.000000e+00 : f32
    %2 = vector.broadcast %cst : f32 to vector<64x128xf32>
    %c0_3 = arith.constant 0 : index
    %c0_4 = arith.constant 0 : index
    %3 = vector.load %arg5[%c0_3, %c0_4] : memref<64x128xf32, #tpu.memory_space<vmem>>, vector<64x128xf32>
    tpu.vector_store %arg5[%c0_3, %c0_4], %2 {strides = array<i32>} : memref<64x128xf32, #tpu.memory_space<vmem>>, vector<64x128xf32>,
    %c0_i32 = arith.constant 0 : i32
    %c256_i32 = arith.constant 256 : i32
    %4 = arith.muli %c0_i32, %c256_i32 : i32
    %5 = tpu.assume_multiple %4, 256 : i32
    %c0_5 = arith.constant 0 : index
    %6 = arith.index_cast %5 : i32 to index
    %7 = vector.load %arg2[%c0_5, %6] : memref<128x256xf32, #tpu.memory_space<vmem>>, vector<128x256xf32>
    %cst_6 = arith.constant dense<0.000000e+00> : vector<64x256xf32>
    %8 = tpu.matmul %1, %7, %cst_6 {dimension_numbers = #tpu.dot_dimension_numbers<[1], [0], [0], [1], [0, 0, 1, 1], [], []>} : vector<64x128xf32>, vector<128x256xf32>, vector<64x256xf32> -> vector<64x256xf32>
    %cst_7 = arith.constant 0.000000e+00 : f32
    %9 = vector.broadcast %cst_7 : f32 to vector<64x256xf32>
    %10 = arith.maximumf %8, %9 : vector<64x256xf32>
    %c0_8 = arith.constant 0 : index
    %c0_9 = arith.constant 0 : index
    %11 = vector.load %arg5[%c0_8, %c0_9] : memref<64x128xf32, #tpu.memory_space<vmem>>, vector<64x128xf32>
    %12 = arith.index_cast %5 : i32 to index
    %c0_10 = arith.constant 0 : index
    %13 = vector.load %arg3[%12, %c0_10] : memref<256x128xf32, #tpu.memory_space<vmem>>, vector<256x128xf32>
    %cst_11 = arith.constant dense<0.000000e+00> : vector<64x128xf32>
    %14 = tpu.matmul %10, %13, %cst_11 {dimension_numbers = #tpu.dot_dimension_numbers<[1], [0], [0], [1], [0, 0, 1, 1], [], []>} : vector<64x256xf32>, vector<256x128xf32>, vector<64x128xf32> -> vector<64x128xf32>
    %15 = arith.addf %11, %14 : vector<64x128xf32>
    %c0_12 = arith.constant 0 : index
    %c0_13 = arith.constant 0 : index
    %16 = vector.load %arg5[%c0_12, %c0_13] : memref<64x128xf32, #tpu.memory_space<vmem>>, vector<64x128xf32>
    tpu.vector_store %arg5[%c0_12, %c0_13], %15 {strides = array<i32>} : memref<64x128xf32, #tpu.memory_space<vmem>>, vector<64x128xf32>,
    %c1_i32 = arith.constant 1 : i32
    %c0_14 = arith.constant 0 : index
    %c0_15 = arith.constant 0 : index
    %17 = vector.load %arg5[%c0_14, %c0_15] : memref<64x128xf32, #tpu.memory_space<vmem>>, vector<64x128xf32>
    %18 = arith.addf %17, %0 : vector<64x128xf32>
    %cst_16 = arith.constant dense<0.000000e+00> : vector<64xf32>
    %19 = vector.multi_reduction <add>, %18, %cst_16 [1] : vector<64x128xf32> to vector<64xf32>
    %20 = vector.shape_cast %19 : vector<64xf32> to vector<64x1xf32>
    %cst_17 = arith.constant 1.280000e+02 : f32
    %21 = vector.broadcast %cst_17 : f32 to vector<64x1xf32>
    %22 = arith.divf %20, %21 : vector<64x1xf32>
    %23 = vector.broadcast %22 : vector<64x1xf32> to vector<64x128xf32>
    %24 = arith.subf %18, %23 : vector<64x128xf32>
    %25 = arith.mulf %24, %24 : vector<64x128xf32>
    %cst_18 = arith.constant dense<0.000000e+00> : vector<64xf32>
    %26 = vector.multi_reduction <add>, %25, %cst_18 [1] : vector<64x128xf32> to vector<64xf32>
    %27 = vector.shape_cast %26 : vector<64xf32> to vector<64x1xf32>
    %cst_19 = arith.constant 1.280000e+02 : f32
    %28 = vector.broadcast %cst_19 : f32 to vector<64x1xf32>
    %29 = arith.divf %27, %28 : vector<64x1xf32>
    %cst_20 = arith.constant 9.99999974E-6 : f32
    %30 = vector.broadcast %cst_20 : f32 to vector<64x1xf32>
    %31 = arith.addf %29, %30 : vector<64x1xf32>
    %32 = math.rsqrt %31 : vector<64x1xf32>
    %33 = vector.broadcast %32 : vector<64x1xf32> to vector<64x128xf32>
    %34 = arith.mulf %24, %33 : vector<64x128xf32>
    %c0_21 = arith.constant 0 : index
    %c0_22 = arith.constant 0 : index
    %35 = vector.load %arg4[%c0_21, %c0_22] : memref<64x128xf32, #tpu.memory_space<vmem>>, vector<64x128xf32>
    tpu.vector_store %arg4[%c0_21, %c0_22], %34 {strides = array<i32>} : memref<64x128xf32, #tpu.memory_space<vmem>>, vector<64x128xf32>,
    return
  }
  func.func @transform_0(%arg0: i32) -> (i32, i32) {
    %c0_i32 = arith.constant 0 : i32
    %c0_i32_0 = arith.constant 0 : i32
    return %arg0, %c0_i32 : i32, i32
  }
  func.func @transform_1(%arg0: i32) -> (i32, i32) {
    %c0_i32 = arith.constant 0 : i32
    %c0_i32_0 = arith.constant 0 : i32
    %c0_i32_1 = arith.constant 0 : i32
    return %c0_i32, %c0_i32_0 : i32, i32
  }
  func.func @transform_2(%arg0: i32) -> (i32, i32) {
    %c0_i32 = arith.constant 0 : i32
    %c0_i32_0 = arith.constant 0 : i32
    %c0_i32_1 = arith.constant 0 : i32
    return %c0_i32, %c0_i32_0 : i32, i32
  }
  func.func @transform_3(%arg0: i32) -> (i32, i32) {
    %c0_i32 = arith.constant 0 : i32
    %c0_i32_0 = arith.constant 0 : i32
    return %arg0, %c0_i32 : i32, i32
  }
}

</mosaic_0001>

<bundles_post_ra>
// kernel: tpu_custom_call.1
= control target key start
LH: loop header
LB: loop body
LE: loop exit
PB: predicated region body
PF: predicated region fallthrough
CT: control target
= control target key end

     0   :  { %8 = vsyncpa [#allocation4], 0  ;;  %s1539_s0 = inlined_call_operand.hbm [shape: f32[96,128], index: 0, kind: input, shape index: {}]   ;;  %s1540_s1 = inlined_call_operand.hbm [shape: f32[128,256], index: 1, kind: input, shape index: {}]   ;;  %s1541_s2 = inlined_call_operand.hbm [shape: f32[256,128], index: 2, kind: input, shape index: {}]   ;;  %s1542_s3 = inlined_call_operand.hbm [shape: f32[96,128], index: 3, kind: output, shape index: {}]  }
   0x1   :  { %10 = vsyncpa [#allocation4 + $0x1], 0 }
   0x2   :  { %11 = vsyncpa [#allocation7], 0 }
   0x3   :  { %12 = vsyncpa [#allocation5], 0 }
   0x4   :  { %14 = vsyncpa [#allocation5 + $0x1], 0  ;;  %s1219_s12 = smov 0   ;;  %s1221_s13 = smov 0  }
   0x5   :  { %s1223_s14 = smov 0   ;;  %s1225_s15 = smov 0  }
   0x6 LB: > { %s1240_s16 = sadd.s32 4294967295, %s1184_s15   ;;  %s797_s17 = sadd.s32 4294967294, %s1184_s15   ;;  %s1184_s15 = sphi %s1225_s15, %s1562_s15   ;;  %s1180_s14 = sphi %s1223_s14, %s1561_s14   ;;  %s1176_s13 = sphi %s1221_s13, %s1560_s13   ;;  %s1172_s12 = sphi %s1219_s12, %s1559_s12  }
   0x7   : > { %s1244_s18 = sadd.s32 1, %s1184_s15   ;;  %s27_s19 = sadd.s32 1, %s1180_s14 }
   0x8   : > { %s24_s20 = ssub.s32 %s1184_s15, %s1244_s18  ;;  %p34_p0 = scmp.ne.s32.totalorder %s1180_s14, %s1176_s13 }
   0x9   : > { %p25_p1 = scmp.eq.s32.totalorder %s24_s20, 0  ;;  %p35_p2 = scmp.eq.s32.totalorder %s1184_s15, 0 }
   0xa   : > { %p40_p3 = scmp.ne.s32.totalorder %s1176_s13, %s1172_s12  ;;  %p1543_p4 = scmp.eq.s32.totalorder %s1240_s16, 0 }
   0xb   : > { %s1256_s21 = scalar_select %p25_p1, %s1180_s14, %s27_s19  }
   0xc   : > { %p1258_p5 = por %p35_p2, %p34_p0  ;;  %p1264_p6 = por %p1543_p4, %p40_p3 }
   0xd   : > { %p106_p7 = scmp.eq.s32.totalorder %s1240_s16, 1  ;;  %p112_p8 = scmp.eq.s32.totalorder %s797_s17, 1 }
   0xe   : > { %s1546_s22 = scalar_select %p1258_p5, 1, 0 }
   0xf   : > { %s1547_s23 = scalar_select %p1264_p6, 1, 0 }
  0x10   : > { %p798_p9 = scmp.ge.s32.totalorder %s1184_s15, 1  ;;  %p119_p10 = scmp.lt.s32.totalorder %s1184_s15, 3 }
  0x11   : > { %p1271_p11 = por %p106_p7, %p34_p0  ;;  %p1275_p12 = por %p112_p8, %p40_p3 }
  0x12   : > { %p1279_p13 = pnand %p798_p9, %p119_p10  ;;  %s1186_s27 = smov [#allocation6]  }
  0x13   : > { %s1548_s24 = scalar_select %p1271_p11, 1, 0 }
  0x14   : > { %s1549_s25 = scalar_select %p1275_p12, 1, 0 }
  0x15   : > { %s1550_s26 = scalar_select %p1279_p13, 1, 0 }
  0x16   : > { %p955_p1 = pneg %p1279_p13  ;;  %s131_s28 = sshll.u32 %s1186_s27, 4  ;;  %s132_s28 = int_to_ptr.vmem [resolvable:$true] %s131_s28 }
  0x17   : > { %s1187_s30 = smov [#allocation8]   ;;  %s1030_s7 = scalar_lea.hbm %s1540_s1, 4096 }
  0x18   : > { %p1287_p2 = pnand %p955_p1, %p1543_p4  ;;  %s144_s4 = sshll.u32 %s1187_s30, 4  ;;  %s1291_s4 = int_to_ptr.vmem [resolvable:$true] %s144_s4 }
  0x19   : > { %p1031_p0 = scmp.ne.s32.totalorder %s1540_s1, %s1030_s7  ;;  %p1037_p9 = scmp.lt.u32.totalorder %s1030_s7, %s1540_s1 }
  0x1a   : > { %p1032_p3 = pneg %p1287_p2 }
  0x1c   : > { %p1033_p7 = pnand %p1032_p3, %p1031_p0 }
  0x1e   : > { %p1034_p8 = pneg %p1033_p7 }
  0x20   : > { %p1039_p10 = pnand %p1037_p9, %p1034_p8 }
  0x22   : > { %1042 = shalt.err (!%p1039_p10)
}
  0x23   : > { %s1043_s17 = scalar_lea.vmem %s132_s28, 4096  ;;  %p1051_p11 = scmp.lt.s32.totalorder %s132_s28, %s132_s28 }
  0x24   : > { %p1044_p1 = scmp.ne.s32.totalorder %s132_s28, %s1043_s17  ;;  %p1052_p6 = scmp.lt.s32.totalorder %s1043_s17, %s1043_s17 }
  0x26   : > { %p1046_p4 = pnand %p1044_p1, %p1032_p3  ;;  %p1053_p13 = por %p1052_p6, %p1051_p11 }
  0x28   : > { %p1047_p12 = pneg %p1046_p4 }
  0x2a   : > { %p1054_p5 = pnand %p1053_p13, %p1047_p12 }
  0x2c   : > { %1057 = shalt.err (!%p1054_p5)
}
  0x2d   : > { %s1188_s19 = smov 256   ;;  %s1189_s20 = smov 16  }
  0x2e   : > { %958 = dma.hbm_to_vmem [thread:$0]  (!%p1287_p2), %s1540_s1, 4096, %s132_s28, [#allocation7], %s1188_s19, %s1188_s19, %s1189_s20  }
  0x2f   : > { %s1058_s7 = scalar_lea.hbm %s1541_s2, 4096 }
  0x30   : > { %p1059_p4 = scmp.ne.s32.totalorder %s1541_s2, %s1058_s7  ;;  %p1065_p11 = scmp.lt.u32.totalorder %s1058_s7, %s1541_s2 }
  0x32   : > { %p1061_p5 = pnand %p1059_p4, %p1032_p3 }
  0x34   : > { %p1062_p6 = pneg %p1061_p5 }
  0x36   : > { %p1067_p12 = pnand %p1065_p11, %p1062_p6 }
  0x38   : > { %1070 = shalt.err (!%p1067_p12)
}
  0x39   : > { %s1071_s28 = scalar_lea.vmem %s1291_s4, 4096  ;;  %p1079_p8 = scmp.lt.s32.totalorder %s1291_s4, %s1291_s4 }
  0x3a   : > { %p1072_p13 = scmp.ne.s32.totalorder %s1291_s4, %s1071_s28  ;;  %p1080_p9 = scmp.lt.s32.totalorder %s1071_s28, %s1071_s28 }
  0x3c   : > { %p1074_p0 = pnand %p1072_p13, %p1032_p3  ;;  %p1081_p10 = por %p1080_p9, %p1079_p8 }
  0x3e   : > { %p1075_p7 = pneg %p1074_p0 }
  0x40   : > { %p1082_p1 = pnand %p1081_p10, %p1075_p7 }
  0x42   : > { %1085 = shalt.err (!%p1082_p1)
}
  0x43   : > { %s1190_s17 = smov 128   ;;  %s1191_s19 = smov 8  }
  0x44   : > { %961 = dma.hbm_to_vmem [thread:$0]  (!%p1287_p2), %s1541_s2, 4096, %s1291_s4, [#allocation7], %s1190_s17, %s1190_s17, %s1191_s19  }
  0x45   : > { %p801_p4 = scmp.ge.s32.totalorder %s1184_s15, 2 }
  0x46   : > { %p1552_p3 = scmp.ne.s32.totalorder (!%p801_p4), %s1546_s22, 0 }
  0x47   : > { %154 = sbr.rel (%p801_p4) target bundleno = 113 (0x71), region = 24 }
  0x4e   : > { %157 = sbr.rel (!%p1552_p3) target bundleno = 113 (0x71), region = 28  ;;  %s158_s30 = sand.u32 (%p1552_p3), 1, %s1180_s14  }
  0x4f   : > { %s803_s5 = sshll.u32 (%p1552_p3), %s1184_s15, 3  ;;  %s802_s6 = sshll.u32 (%p1552_p3), %s158_s30, 6 }
  0x50   : > { %s164_s7 = ssub.s32 (%p1552_p3), 12, %s803_s5  ;;  %s1350_s8 = scalar_lea.sflag (%p1552_p3), [#allocation4], %s158_s30 }
  0x51   : > { %p165_p5 = scmp.lt.s32.totalorder (%p1552_p3), %s164_s7, 8  ;;  %s162_s9 = scalar_lea.vmem (%p1552_p3), [#allocation3], %s802_s6 }
  0x55   : > { %s1564_s7 = smov (!%p165_p5, %s164_s7), 8 }
  0x56   : > { %s1347_s29 = sshll.u32 %s1564_s7, 7 }
  0x57   : > { %s169_s4 = ssub.s32 1024, %s1347_s29 }
  0x58   : > { %170 = vsyncadd %s1350_s8, %s169_s4  ;;  %p805_p2 = scmp.ne.s32.totalorder %s1347_s29, 0  ;;  %s823_s22 = sshll.u32 %s1184_s15, 10 }
  0x59   : > { %s1358_s28 = scalar_lea.hbm %s1539_s0, %s823_s22  ;;  %s175_s17 = sshll.u32 %s162_s9, 4  ;;  %s1360_s17 = int_to_ptr.vmem [resolvable:$true] %s175_s17 }
  0x5a   : > { %s1086_s19 = scalar_lea.hbm %s1358_s28, %s1347_s29  ;;  %s1090_s30 = scalar_lea.hbm %s1539_s0, 1536 }
  0x5b   : > { %p1087_p6 = scmp.ne.s32.totalorder %s1358_s28, %s1086_s19  ;;  %p1091_p13 = scmp.lt.u32.totalorder %s1358_s28, %s1539_s0 }
  0x5c   : > { %p1092_p0 = scmp.lt.u32.totalorder %s1090_s30, %s1086_s19  ;;  %p1094_p8 = scmp.lt.u32.totalorder %s1086_s19, %s1358_s28 }
  0x5d   : > { %p1088_p11 = pnand %p1087_p6, %p805_p2 }
  0x5e   : > { %p1093_p7 = por %p1092_p0, %p1091_p13 }
  0x5f   : > { %p1089_p12 = pneg %p1088_p11 }
  0x60   : > { %p1095_p9 = por %p1094_p8, %p1093_p7 }
  0x62   : > { %p1096_p10 = pnand %p1095_p9, %p1089_p12 }
  0x64   : > { %1099 = shalt.err (!%p1096_p10)
}
  0x65   : > { %s1100_s7 = scalar_lea.vmem %s1360_s17, %s1347_s29  ;;  %s1192_s4 = smov [#allocation3]  }
  0x66   : > { %p1101_p1 = scmp.ne.s32.totalorder %s1360_s17, %s1100_s7  ;;  %s1104_s9 = sshll.u32 %s1192_s4, 4  ;;  %s1105_s9 = int_to_ptr.vmem [resolvable:$false] %s1104_s9 }
  0x67   : > { %s1106_s22 = scalar_lea.vmem %s1105_s9, 2048  ;;  %p1107_p6 = scmp.lt.s32.totalorder %s1360_s17, %s1105_s9 }
  0x68   : > { %p1102_p3 = pnand %p1101_p1, %p805_p2  ;;  %p1108_p11 = scmp.lt.s32.totalorder %s1106_s22, %s1100_s7 }
  0x6a   : > { %p1103_p5 = pneg %p1102_p3  ;;  %p1109_p13 = por %p1108_p11, %p1107_p6 }
  0x6c   : > { %p1110_p0 = pnand %p1109_p13, %p1103_p5 }
  0x6e   : > { %1113 = shalt.err (!%p1110_p0)
}
  0x6f   : > { %s1193_s10 = smov 128   ;;  %s1194_s11 = smov 8  }
  0x70   : > { %181 = dma.hbm_to_vmem [thread:$0]  (%p805_p2), %s1358_s28, %s1347_s29, %s1360_s17, %s1350_s8, %s1193_s10, %s1193_s10, %s1194_s11  }
  0x71 PF: > { %p1553_p12 = scmp.ne.s32.totalorder %s1550_s26, 0 }
  0x72   : > { %s1390_s19 = sand.u32 (!%p1553_p12), 1, %s1176_s13   ;;  %p1554_p7 = scmp.ne.s32.totalorder (!%p1553_p12), %s1547_s23, 0 }
  0x73   : > { %187 = sbr.rel (%p1553_p12) target bundleno = 958 (0x3be), region = 32  ;;  %s810_s20 = sshll.u32 (!%p1553_p12), %s1390_s19, 6 }
  0x74   : > { %s190_s27 = scalar_lea.sflag (!%p1553_p12), [#allocation4], %s1390_s19  ;;  %s1396_s30 = scalar_lea.vmem (!%p1553_p12), [#allocation3], %s810_s20 }
  0x7a   : > { %1159 = dma.done.wait (%p1554_p7), %s190_s27, 1024  }
  0x7b   : > { %1161 = vsyncadd (%p1554_p7), %s190_s27, 4294966272  ;;  %p1555_p2 = scmp.eq.s32.totalorder %s1240_s16, 0 }
  0x7d   : > { %1163 = dma.done.wait (%p1555_p2), [#allocation7], 8192   ;;  %p1556_p8 = pmov %p1555_p2 }
  0x7e   : > { %v1195_v0 = vmov 0.0   ;;  %v251_v1 = vld [vmem:[#allocation6 + $0x8] sm:$0xff]  ;;  %v253_v2 = vld [vmem:[#allocation6 + $0x18] sm:$0xff]  ;;  %v250_v3 = vld [vmem:[#allocation6] sm:$0xff]  ;;  %s1464_s23 = scalar_lea.vmem [#allocation9], %s810_s20  ;;  %s686_s26 = scalar_lea.sflag [#allocation5], %s1390_s19 }
  0x7f   : > { %1165 = vsyncadd (%p1556_p8), [#allocation7], 4294959104  ;;  %346 = vmatprep.mubr.f32.mxu0 %v1195_v0  ;;  %v881_v4 = vpack.c.bf16 %v253_v2, %v251_v1  ;;  %v252_v5 = vld [vmem:[#allocation6 + $0x10] sm:$0xff]  ;;  %v255_v6 = vld [vmem:[#allocation6 + $0x28] sm:$0xff]  ;;  %p1557_p9 = scmp.ne.s32.totalorder %s1548_s24, 0 }
  0x80   : > { %v257_v7 = vld [vmem:[#allocation6 + $0x38] sm:$0xff]  ;;  %v883_v8 = vpack.c.bf16 %v252_v5, %v250_v3  ;;  %v254_v10 = vld [vmem:[#allocation6 + $0x20] sm:$0xff]  ;;  %v256_v11 = vld [vmem:[#allocation6 + $0x30] sm:$0xff]  ;;  %s815_s29 = sshll.u32 (%p1557_p9), %s1240_s16, 3 }
  0x81   : > { %v885_v9 = vpack.c.bf16 %v257_v7, %v255_v6  ;;  %v259_v12 = vld [vmem:[#allocation6 + $0x48] sm:$0xff]  ;;  %882 = vmatprep.subr.bf16.mxu0 %v881_v4  ;;  %v261_v13 = vld [vmem:[#allocation6 + $0x58] sm:$0xff]  ;;  %v887_v14 = vpack.c.bf16 %v256_v11, %v254_v10  ;;  %v258_v16 = vld [vmem:[#allocation6 + $0x40] sm:$0xff]  ;;  %s694_s8 = ssub.s32 (%p1557_p9), 12, %s815_s29 }
  0x82   : > { %884 = vmatpush1.bf16.msra.mxu0 %v883_v8  ;;  %v889_v15 = vpack.c.bf16 %v261_v13, %v259_v12  ;;  %v260_v17 = vld [vmem:[#allocation6 + $0x50] sm:$0xff]  ;;  %v263_v18 = vld [vmem:[#allocation6 + $0x68] sm:$0xff]  ;;  %v265_v19 = vld [vmem:[#allocation6 + $0x78] sm:$0xff]  ;;  %p695_p10 = scmp.lt.s32.totalorder (%p1557_p9), %s694_s8, 8 }
  0x83   : > { %886 = vmatprep.subr.bf16.mxu0 %v885_v9  ;;  %v891_v20 = vpack.c.bf16 %v260_v17, %v258_v16  ;;  %v893_v21 = vpack.c.bf16 %v265_v19, %v263_v18  ;;  %v262_v22 = vld [vmem:[#allocation6 + $0x60] sm:$0xff]  ;;  %v264_v23 = vld [vmem:[#allocation6 + $0x70] sm:$0xff]  ;;  %v267_v24 = vld [vmem:[#allocation6 + $0x88] sm:$0xff] }
  0x84   : > { %v269_v25 = vld [vmem:[#allocation6 + $0x98] sm:$0xff]  ;;  %v895_v26 = vpack.c.bf16 %v264_v23, %v262_v22  ;;  %v266_v27 = vld [vmem:[#allocation6 + $0x80] sm:$0xff]  ;;  %v268_v28 = vld [vmem:[#allocation6 + $0x90] sm:$0xff] }
  0x85   : > { %v271_v29 = vld [vmem:[#allocation6 + $0xa8] sm:$0xff]  ;;  %v897_v30 = vpack.c.bf16 %v269_v25, %v267_v24  ;;  %v273_v31 = vld [vmem:[#allocation6 + $0xb8] sm:$0xff]  ;;  %v435_v32 = vld [vmem:[#allocation8 + $0x80] sm:$0xff]  ;;  %v899_v42 = vpack.c.bf16 %v268_v28, %v266_v27 }
  0x86   : > { %888 = vmatpush1.bf16.msra.mxu0 %v887_v14  ;;  %v436_v33 = vld [vmem:[#allocation8 + $0x88] sm:$0xff]  ;;  %v419_v35 = vld [vmem:[#allocation8] sm:$0xff]  ;;  %v437_v37 = vld [vmem:[#allocation8 + $0x90] sm:$0xff]  ;;  %v901_v46 = vpack.c.bf16 %v273_v31, %v271_v29 }
  0x87   : > { %890 = vmatprep.subr.bf16.mxu0 %v889_v15  ;;  %v913_v34 = vpack.c.bf16 %v436_v33, %v435_v32  ;;  %v420_v36 = vld [vmem:[#allocation8 + $0x8] sm:$0xff]  ;;  %v438_v39 = vld [vmem:[#allocation8 + $0x98] sm:$0xff]  ;;  %v421_v40 = vld [vmem:[#allocation8 + $0x10] sm:$0xff] }
  0x88   : > { %v915_v38 = vpack.c.bf16 %v420_v36, %v419_v35  ;;  %v422_v41 = vld [vmem:[#allocation8 + $0x18] sm:$0xff]  ;;  %v917_v43 = vpack.c.bf16 %v438_v39, %v437_v37  ;;  %v439_v44 = vld [vmem:[#allocation8 + $0xa0] sm:$0xff]  ;;  %v440_v45 = vld [vmem:[#allocation8 + $0xa8] sm:$0xff] }
  0x89   : > { %914 = vmatprep.subr.bf16.mxu1 %v913_v34  ;;  %v270_v47 = vld [vmem:[#allocation6 + $0xa0] sm:$0xff]  ;;  %v272_v48 = vld [vmem:[#allocation6 + $0xb0] sm:$0xff]  ;;  %v275_v49 = vld [vmem:[#allocation6 + $0xc8] sm:$0xff]  ;;  %v919_v50 = vpack.c.bf16 %v422_v41, %v421_v40  ;;  %v921_v52 = vpack.c.bf16 %v440_v45, %v439_v44 }
  0x8a   : > { %892 = vmatpush1.bf16.msra.mxu0 %v891_v20  ;;  %916 = vmatpush3.bf16.msra.mxu1 %v915_v38  ;;  %v277_v51 = vld [vmem:[#allocation6 + $0xd8] sm:$0xff]  ;;  %v423_v53 = vld [vmem:[#allocation8 + $0x20] sm:$0xff]  ;;  %v424_v54 = vld [vmem:[#allocation8 + $0x28] sm:$0xff]  ;;  %v903_v57 = vpack.c.bf16 %v272_v48, %v270_v47 }
  0x8b   : > { %894 = vmatprep.subr.bf16.mxu0 %v893_v21  ;;  %918 = vmatprep.subr.bf16.mxu1 %v917_v43  ;;  %v441_v55 = vld [vmem:[#allocation8 + $0xb0] sm:$0xff]  ;;  %v442_v56 = vld [vmem:[#allocation8 + $0xb8] sm:$0xff]  ;;  %v905_v58 = vpack.c.bf16 %v277_v51, %v275_v49  ;;  %v274_v59 = vld [vmem:[#allocation6 + $0xc0] sm:$0xff]  ;;  %v923_v62 = vpack.c.bf16 %v424_v54, %v423_v53 }
  0x8c   : > { %v276_v60 = vld [vmem:[#allocation6 + $0xd0] sm:$0xff]  ;;  %v279_v61 = vld [vmem:[#allocation6 + $0xe8] sm:$0xff]  ;;  %v281_v63 = vld [vmem:[#allocation6 + $0xf8] sm:$0xff]  ;;  %v925_v1 = vpack.c.bf16 %v442_v56, %v441_v55 }
  0x8d   : > { %v425_v2 = vld [vmem:[#allocation8 + $0x30] sm:$0xff]  ;;  %v426_v3 = vld [vmem:[#allocation8 + $0x38] sm:$0xff]  ;;  %v443_v4 = vld [vmem:[#allocation8 + $0xc0] sm:$0xff]  ;;  %v907_v6 = vpack.c.bf16 %v276_v60, %v274_v59  ;;  %v909_v7 = vpack.c.bf16 %v281_v63, %v279_v61 }
  0x8e   : > { %896 = vmatpush1.bf16.msra.mxu0 %v895_v26  ;;  %920 = vmatpush3.bf16.msra.mxu1 %v919_v50  ;;  %v444_v5 = vld [vmem:[#allocation8 + $0xc8] sm:$0xff]  ;;  %v278_v8 = vld [vmem:[#allocation6 + $0xe0] sm:$0xff]  ;;  %v280_v9 = vld [vmem:[#allocation6 + $0xf0] sm:$0xff]  ;;  %v927_v10 = vpack.c.bf16 %v426_v3, %v425_v2 }
  0x8f   : > { %898 = vmatprep.subr.bf16.mxu0 %v897_v30  ;;  %922 = vmatprep.subr.bf16.mxu1 %v921_v52  ;;  %v929_v11 = vpack.c.bf16 %v444_v5, %v443_v4  ;;  %v427_v12 = vld [vmem:[#allocation8 + $0x40] sm:$0xff]  ;;  %v428_v13 = vld [vmem:[#allocation8 + $0x48] sm:$0xff]  ;;  %v445_v14 = vld [vmem:[#allocation8 + $0xd0] sm:$0xff]  ;;  %v911_v16 = vpack.c.bf16 %v280_v9, %v278_v8 }
  0x90   : > { %v446_v15 = vld [vmem:[#allocation8 + $0xd8] sm:$0xff]  ;;  %v931_v17 = vpack.c.bf16 %v428_v13, %v427_v12  ;;  %v429_v19 = vld [vmem:[#allocation8 + $0x50] sm:$0xff]  ;;  %v447_v21 = vld [vmem:[#allocation8 + $0xe0] sm:$0xff] }
  0x91   : > { %v933_v18 = vpack.c.bf16 %v446_v15, %v445_v14  ;;  %v430_v20 = vld [vmem:[#allocation8 + $0x58] sm:$0xff]  ;;  %v448_v22 = vld [vmem:[#allocation8 + $0xe8] sm:$0xff]  ;;  %v1408_v23 = vld [vmem:[%s1396_s30] sm:$0xff] }
  0x92   : > { %900 = vmatpush1.bf16.msra.mxu0 %v899_v42  ;;  %924 = vmatpush3.bf16.msra.mxu1 %v923_v62  ;;  %v935_v24 = vpack.c.bf16 %v430_v20, %v429_v19  ;;  %v937_v25 = vpack.c.bf16 %v448_v22, %v447_v21  ;;  %v431_v26 = vld [vmem:[#allocation8 + $0x60] sm:$0xff]  ;;  %v432_v27 = vld [vmem:[#allocation8 + $0x68] sm:$0xff]  ;;  %v1418_v30 = vld [vmem:[%s1396_s30 + $0x10] sm:$0xff] }
  0x93   : > { %902 = vmatprep.subr.bf16.mxu0 %v901_v46  ;;  %926 = vmatprep.subr.bf16.mxu1 %v925_v1  ;;  %v1413_v28 = vld [vmem:[%s1396_s30 + $0x8] sm:$0xff]  ;;  %v939_v29 = vpack.c.bf16 %v432_v27, %v431_v26  ;;  %v1423_v31 = vld [vmem:[%s1396_s30 + $0x18] sm:$0xff]  ;;  %v1428_v32 = vld [vmem:[%s1396_s30 + $0x20] sm:$0xff] }
  0x94   : > { %v1433_v33 = vld [vmem:[%s1396_s30 + $0x28] sm:$0xff]  ;;  %v1438_v34 = vld [vmem:[%s1396_s30 + $0x30] sm:$0xff]  ;;  %v1443_v35 = vld [vmem:[%s1396_s30 + $0x38] sm:$0xff] }
  0x95   : > { %v449_v36 = vld [vmem:[#allocation8 + $0xf0] sm:$0xff]  ;;  %v450_v37 = vld [vmem:[#allocation8 + $0xf8] sm:$0xff] }
  0x96   : > { %904 = vmatpush1.bf16.msra.mxu0 %v903_v57  ;;  %928 = vmatpush3.bf16.msra.mxu1 %v927_v10  ;;  %v941_v38 = vpack.c.bf16 %v450_v37, %v449_v36  ;;  %v433_v39 = vld [vmem:[#allocation8 + $0x70] sm:$0xff]  ;;  %v434_v40 = vld [vmem:[#allocation8 + $0x78] sm:$0xff] }
  0x97   : > { %906 = vmatprep.subr.bf16.mxu0 %v905_v58  ;;  %930 = vmatprep.subr.bf16.mxu1 %v929_v11  ;;  %v943_v41 = vpack.c.bf16 %v434_v40, %v433_v39 }
  0x9a   : > { %908 = vmatpush1.bf16.msra.mxu0 %v907_v6  ;;  %932 = vmatpush3.bf16.msra.mxu1 %v931_v17 }
  0x9b   : > { %910 = vmatprep.subr.bf16.mxu0 %v909_v7  ;;  %934 = vmatprep.subr.bf16.mxu1 %v933_v18 }
  0x9e   : > { %912 = vmatpush1.bf16.msra.mxu0 %v911_v16  ;;  %936 = vmatpush3.bf16.msra.mxu1 %v935_v24 }
  0x9f   : > { %938 = vmatprep.subr.bf16.mxu1 %v937_v25 }
  0xa1   : > { %347 = vmatmul.mubr.f32.vlgmr.msra.gmra.mrb[0].mxu0 %v1408_v23 }
  0xa2   : > { %352 = vmatprep.mubr.f32.mxu0 %v1195_v0  ;;  %940 = vmatpush3.bf16.msra.mxu1 %v939_v29 }
  0xa3   : > { %942 = vmatprep.subr.bf16.mxu1 %v941_v38 }
  0xa5   : > { %353 = vmatmul.mubr.f32.gmra.mrb[2].mxu0 %v1413_v28 }
  0xa6   : > { %358 = vmatprep.mubr.f32.mxu0 %v1195_v0  ;;  %944 = vmatpush3.bf16.msra.mxu1 %v943_v41 }
  0xa9   : > { %359 = vmatmul.mubr.f32.gmra.mrb[4].mxu0 %v1418_v30 }
  0xaa   : > { %364 = vmatprep.mubr.f32.mxu0 %v1195_v0 }
  0xad   : > { %365 = vmatmul.mubr.f32.gmra.mrb[6].mxu0 %v1423_v31 }
  0xae   : > { %370 = vmatprep.mubr.f32.mxu0 %v1195_v0 }
  0xb1   : > { %371 = vmatmul.mubr.f32.gmra.mrb[8].mxu0 %v1428_v32 }
  0xb2   : > { %376 = vmatprep.mubr.f32.mxu0 %v1195_v0 }
  0xb5   : > { %377 = vmatmul.mubr.f32.gmra.mrb[10].mxu0 %v1433_v33 }
  0xb6   : > { %382 = vmatprep.mubr.f32.mxu0 %v1195_v0 }
  0xb9   : > { %383 = vmatmul.mubr.f32.gmra.mrb[12].mxu0 %v1438_v34 }
  0xba   : > { %388 = vmatprep.mubr.f32.mxu0 %v1195_v0 }
  0xbd   : > { %389 = vmatmul.mubr.f32.gmra.mrb[14].mxu0 %v1443_v35 }
 0x174   : > { %v348_v42 = vpop.f32.mrb[0].mxu0 }
 0x175   : > { %v350_v43 = vpop.f32.mrb[1].mxu0  ;;  %v395_v45 = vmax.f32 %v348_v42, 0.0 }
 0x176   : > { %v396_v44 = vmax.f32 %v350_v43, 0.0 }
 0x178   : > { %v354_v46 = vpop.f32.mrb[2].mxu0  ;;  %515 = vmatprep.mubr.f32.mxu1 %v396_v44 }
 0x179   : > { %v356_v47 = vpop.f32.mrb[3].mxu0  ;;  %516 = vmatmul.mubr.f32.vlgmr.msra.gmra.mrb[0].mxu1 %v395_v45  ;;  %v397_v48 = vmax.f32 %v354_v46, 0.0 }
 0x17a   : > { %v398_v0 = vmax.f32 %v356_v47, 0.0 }
 0x17c   : > { %v360_v49 = vpop.f32.mrb[4].mxu0  ;;  %520 = vmatprep.mubr.f32.mxu1 %v398_v0 }
 0x17d   : > { %v362_v50 = vpop.f32.mrb[5].mxu0  ;;  %521 = vmatmul.mubr.f32.gmra.mrb[2].mxu1 %v397_v48  ;;  %v399_v52 = vmax.f32 %v360_v49, 0.0 }
 0x17e   : > { %v400_v51 = vmax.f32 %v362_v50, 0.0 }
 0x180   : > { %v366_v53 = vpop.f32.mrb[6].mxu0  ;;  %525 = vmatprep.mubr.f32.mxu1 %v400_v51 }
 0x181   : > { %v368_v54 = vpop.f32.mrb[7].mxu0  ;;  %526 = vmatmul.mubr.f32.gmra.mrb[4].mxu1 %v399_v52  ;;  %v401_v56 = vmax.f32 %v366_v53, 0.0 }
 0x182   : > { %v402_v55 = vmax.f32 %v368_v54, 0.0 }
 0x184   : > { %v372_v57 = vpop.f32.mrb[8].mxu0  ;;  %530 = vmatprep.mubr.f32.mxu1 %v402_v55 }
 0x185   : > { %v374_v58 = vpop.f32.mrb[9].mxu0  ;;  %531 = vmatmul.mubr.f32.gmra.mrb[6].mxu1 %v401_v56  ;;  %v403_v60 = vmax.f32 %v372_v57, 0.0 }
 0x186   : > { %v404_v59 = vmax.f32 %v374_v58, 0.0 }
 0x188   : > { %v378_v61 = vpop.f32.mrb[10].mxu0  ;;  %535 = vmatprep.mubr.f32.mxu1 %v404_v59 }
 0x189   : > { %v380_v62 = vpop.f32.mrb[11].mxu0  ;;  %536 = vmatmul.mubr.f32.gmra.mrb[8].mxu1 %v403_v60  ;;  %v405_v1 = vmax.f32 %v378_v61, 0.0 }
 0x18a   : > { %v406_v63 = vmax.f32 %v380_v62, 0.0 }
 0x18c   : > { %v384_v2 = vpop.f32.mrb[12].mxu0  ;;  %540 = vmatprep.mubr.f32.mxu1 %v406_v63 }
 0x18d   : > { %v386_v3 = vpop.f32.mrb[13].mxu0  ;;  %541 = vmatmul.mubr.f32.gmra.mrb[10].mxu1 %v405_v1  ;;  %v407_v5 = vmax.f32 %v384_v2, 0.0 }
 0x18e   : > { %v408_v4 = vmax.f32 %v386_v3, 0.0 }
 0x190   : > { %v390_v6 = vpop.f32.mrb[14].mxu0  ;;  %545 = vmatprep.mubr.f32.mxu1 %v408_v4 }
 0x191   : > { %v392_v7 = vpop.f32.mrb[15].mxu0  ;;  %546 = vmatmul.mubr.f32.gmra.mrb[12].mxu1 %v407_v5  ;;  %v409_v9 = vmax.f32 %v390_v6, 0.0 }
 0x192   : > { %v410_v8 = vmax.f32 %v392_v7, 0.0 }
 0x194   : > { %550 = vmatprep.mubr.f32.mxu1 %v410_v8 }
 0x195   : > { %551 = vmatmul.mubr.f32.gmra.mrb[14].mxu1 %v409_v9 }
 0x24c   : > { %v857_v10 = vpop.f32.mrb[0].mxu1 }
 0x24d   : > { %v858_v11 = vpop.f32.mrb[1].mxu1 }
 0x24e   : > { %v859_v12 = vadd.f32 %v858_v11, %v857_v10 }
 0x250   : > { %v860_v13 = vpop.f32.mrb[2].mxu1  ;;  %v580_v14 = vadd.f32 %v859_v12, %v1408_v23 }
 0x251   : > { %v861_v15 = vpop.f32.mrb[3].mxu1 }
 0x252   : > { %v862_v16 = vadd.f32 %v861_v15, %v860_v13  ;;  %588 = vadd.xlane.f32.xlu0 %v580_v14 }
 0x254   : > { %v863_v17 = vpop.f32.mrb[4].mxu1  ;;  %v581_v18 = vadd.f32 %v862_v16, %v1413_v28 }
 0x255   : > { %v864_v19 = vpop.f32.mrb[5].mxu1 }
 0x256   : > { %v865_v20 = vadd.f32 %v864_v19, %v863_v17  ;;  %590 = vadd.xlane.f32.xlu0 %v581_v18 }
 0x258   : > { %v866_v21 = vpop.f32.mrb[6].mxu1  ;;  %v582_v22 = vadd.f32 %v865_v20, %v1418_v30 }
 0x259   : > { %v867_v24 = vpop.f32.mrb[7].mxu1 }
 0x25a   : > { %v868_v25 = vadd.f32 %v867_v24, %v866_v21  ;;  %592 = vadd.xlane.f32.xlu1 %v582_v22 }
 0x25c   : > { %v869_v26 = vpop.f32.mrb[8].mxu1  ;;  %v583_v27 = vadd.f32 %v868_v25, %v1423_v31 }
 0x25d   : > { %v870_v29 = vpop.f32.mrb[9].mxu1 }
 0x25e   : > { %v871_v23 = vadd.f32 %v870_v29, %v869_v26  ;;  %594 = vadd.xlane.f32.xlu1 %v583_v27 }
 0x260   : > { %v872_v36 = vpop.f32.mrb[10].mxu1  ;;  %v584_v37 = vadd.f32 %v871_v23, %v1428_v32 }
 0x261   : > { %v873_v38 = vpop.f32.mrb[11].mxu1 }
 0x262   : > { %v874_v28 = vadd.f32 %v873_v38, %v872_v36  ;;  %596 = vadd.xlane.f32.xlu0 %v584_v37 }
 0x264   : > { %v875_v39 = vpop.f32.mrb[12].mxu1  ;;  %v585_v40 = vadd.f32 %v874_v28, %v1433_v33 }
 0x265   : > { %v876_v41 = vpop.f32.mrb[13].mxu1 }
 0x266   : > { %v877_v30 = vadd.f32 %v876_v41, %v875_v39  ;;  %598 = vadd.xlane.f32.xlu1 %v585_v40 }
 0x268   : > { %v878_v42 = vpop.f32.mrb[14].mxu1  ;;  %v586_v43 = vadd.f32 %v877_v30, %v1438_v34 }
 0x269   : > { %v879_v44 = vpop.f32.mrb[15].mxu1 }
 0x26a   : > { %v880_v31 = vadd.f32 %v879_v44, %v878_v42  ;;  %600 = vadd.xlane.f32.xlu0 %v586_v43 }
 0x26c   : > { %v587_v45 = vadd.f32 %v880_v31, %v1443_v35 }
 0x26e   : > { %602 = vadd.xlane.f32.xlu1 %v587_v45 }
 0x2df   : > { %v589_v46 = vpop.xlane.xlu0 %588 }
 0x2e0   : > { %v605_v32 = vmul.f32 0.0078125, %v589_v46 }
 0x2e2   : > { %v613_v47 = vsub.f32 %v580_v14, %v605_v32 }
 0x2e3   : > { %v591_v0 = vpop.xlane.xlu0 %590 }
 0x2e4   : > { %v606_v48 = vmul.f32 0.0078125, %v591_v0  ;;  %v621_v49 = vmul.f32 %v613_v47, %v613_v47 }
 0x2e6   : > { %v614_v50 = vsub.f32 %v581_v18, %v606_v48  ;;  %629 = vadd.xlane.f32.xlu0 %v621_v49 }
 0x2e7   : > { %v593_v33 = vpop.xlane.xlu1 %592 }
 0x2e8   : > { %v607_v51 = vmul.f32 0.0078125, %v593_v33  ;;  %v622_v52 = vmul.f32 %v614_v50, %v614_v50 }
 0x2ea   : > { %v615_v53 = vsub.f32 %v582_v22, %v607_v51  ;;  %631 = vadd.xlane.f32.xlu1 %v622_v52 }
 0x2eb   : > { %v595_v34 = vpop.xlane.xlu1 %594 }
 0x2ec   : > { %v608_v54 = vmul.f32 0.0078125, %v595_v34  ;;  %v623_v55 = vmul.f32 %v615_v53, %v615_v53 }
 0x2ee   : > { %v616_v56 = vsub.f32 %v583_v27, %v608_v54  ;;  %633 = vadd.xlane.f32.xlu0 %v623_v55 }
 0x2ef   : > { %v597_v35 = vpop.xlane.xlu0 %596 }
 0x2f0   : > { %v609_v57 = vmul.f32 0.0078125, %v597_v35  ;;  %v624_v58 = vmul.f32 %v616_v56, %v616_v56 }
 0x2f2   : > { %v1454_v59 = vsub.f32 %v584_v37, %v609_v57  ;;  %635 = vadd.xlane.f32.xlu1 %v624_v58 }
 0x2f3   : > { %v599_v60 = vpop.xlane.xlu1 %598 }
 0x2f4   : > { %v610_v61 = vmul.f32 0.0078125, %v599_v60  ;;  %v625_v62 = vmul.f32 %v1454_v59, %v1454_v59 }
 0x2f6   : > { %v1458_v63 = vsub.f32 %v585_v40, %v610_v61  ;;  %637 = vadd.xlane.f32.xlu0 %v625_v62 }
 0x2f7   : > { %v601_v1 = vpop.xlane.xlu0 %600 }
 0x2f8   : > { %v611_v2 = vmul.f32 0.0078125, %v601_v1  ;;  %v626_v3 = vmul.f32 %v1458_v63, %v1458_v63 }
 0x2fa   : > { %v619_v4 = vsub.f32 %v586_v43, %v611_v2  ;;  %639 = vadd.xlane.f32.xlu1 %v626_v3 }
 0x2fb   : > { %v603_v5 = vpop.xlane.xlu1 %602 }
 0x2fc   : > { %v612_v6 = vmul.f32 0.0078125, %v603_v5  ;;  %v627_v7 = vmul.f32 %v619_v4, %v619_v4 }
 0x2fe   : > { %v620_v8 = vsub.f32 %v587_v45, %v612_v6  ;;  %641 = vadd.xlane.f32.xlu0 %v627_v7 }
 0x300   : > { %v628_v9 = vmul.f32 %v620_v8, %v620_v8 }
 0x302   : > { %643 = vadd.xlane.f32.xlu1 %v628_v9 }
 0x373   : > { %v630_v10 = vpop.xlane.xlu0 %629 }
 0x374   : > { %v645_v11 = vmul.f32 0.0078125, %v630_v10 }
 0x376   : > { %v653_v12 = vadd.f32 1e-05, %v645_v11 }
 0x377   : > { %v632_v13 = vpop.xlane.xlu1 %631 }
 0x378   : > { %1014 = vrsqrt.f32 %v653_v12  ;;  %v646_v14 = vmul.f32 0.0078125, %v632_v13 }
 0x37a   : > { %v654_v15 = vadd.f32 1e-05, %v646_v14 }
 0x37b   : > { %v634_v16 = vpop.xlane.xlu0 %633 }
 0x37c   : > { %1016 = vrsqrt.f32 %v654_v15  ;;  %v647_v17 = vmul.f32 0.0078125, %v634_v16 }
 0x37e   : > { %v655_v18 = vadd.f32 1e-05, %v647_v17 }
 0x37f   : > { %v636_v19 = vpop.xlane.xlu1 %635 }
 0x380   : > { %1018 = vrsqrt.f32 %v655_v18  ;;  %v648_v20 = vmul.f32 0.0078125, %v636_v19 }
 0x382   : > { %v1015_v21 = vpop.eup %1014  ;;  %v656_v22 = vadd.f32 1e-05, %v648_v20 }
 0x383   : > { %v669_v24 = vmul.f32 %v1015_v21, %v613_v47  ;;  %v638_v25 = vpop.xlane.xlu0 %637 }
 0x384   : > { %1020 = vrsqrt.f32 %v656_v22  ;;  %v649_v26 = vmul.f32 0.0078125, %v638_v25 }
 0x385   : > { %677 = vst [vmem:[%s1464_s23] sm:$0xff] %v669_v24 }
 0x386   : > { %v1017_v27 = vpop.eup %1016  ;;  %v657_v29 = vadd.f32 1e-05, %v649_v26 }
 0x387   : > { %v670_v23 = vmul.f32 %v1017_v27, %v614_v50  ;;  %v640_v36 = vpop.xlane.xlu1 %639 }
 0x388   : > { %1022 = vrsqrt.f32 %v657_v29  ;;  %v650_v37 = vmul.f32 0.0078125, %v640_v36 }
 0x389   : > { %678 = vst [vmem:[%s1464_s23 + $0x8] sm:$0xff] %v670_v23 }
 0x38a   : > { %v1019_v38 = vpop.eup %1018  ;;  %v658_v28 = vadd.f32 1e-05, %v650_v37 }
 0x38b   : > { %v671_v39 = vmul.f32 %v1019_v38, %v615_v53  ;;  %v642_v40 = vpop.xlane.xlu0 %641 }
 0x38c   : > { %1024 = vrsqrt.f32 %v658_v28  ;;  %v651_v41 = vmul.f32 0.0078125, %v642_v40 }
 0x38d   : > { %679 = vst [vmem:[%s1464_s23 + $0x10] sm:$0xff] %v671_v39 }
 0x38e   : > { %v1021_v30 = vpop.eup %1020  ;;  %v659_v42 = vadd.f32 1e-05, %v651_v41 }
 0x38f   : > { %v672_v43 = vmul.f32 %v1021_v30, %v616_v56  ;;  %v644_v44 = vpop.xlane.xlu1 %643 }
 0x390   : > { %1026 = vrsqrt.f32 %v659_v42  ;;  %v652_v31 = vmul.f32 0.0078125, %v644_v44 }
 0x391   : > { %680 = vst [vmem:[%s1464_s23 + $0x18] sm:$0xff] %v672_v43 }
 0x392   : > { %v1023_v45 = vpop.eup %1022  ;;  %v660_v46 = vadd.f32 1e-05, %v652_v31 }
 0x393   : > { %v673_v32 = vmul.f32 %v1023_v45, %v1454_v59 }
 0x394   : > { %1028 = vrsqrt.f32 %v660_v46 }
 0x395   : > { %681 = vst [vmem:[%s1464_s23 + $0x20] sm:$0xff] %v673_v32 }
 0x396   : > { %v1025_v47 = vpop.eup %1024 }
 0x397   : > { %v674_v0 = vmul.f32 %v1025_v47, %v1458_v63 }
 0x399   : > { %682 = vst [vmem:[%s1464_s23 + $0x28] sm:$0xff] %v674_v0 }
 0x39a   : > { %v1027_v48 = vpop.eup %1026 }
 0x39b   : > { %v675_v49 = vmul.f32 %v1027_v48, %v619_v4  ;;  %692 = sbr.rel (!%p1557_p9) target bundleno = 958 (0x3be), region = 48 }
 0x39d   : > { %683 = vst [vmem:[%s1464_s23 + $0x30] sm:$0xff] %v675_v49 }
 0x39e   : > { %v1029_v50 = vpop.eup %1028 }
 0x39f   : > { %v676_v33 = vmul.f32 %v1029_v50, %v620_v8 }
 0x3a1   : > { %684 = vst [vmem:[%s1464_s23 + $0x38] sm:$0xff] %v676_v33 }
 0x3a2   : > { %s1566_s8 = smov (!%p695_p10, %s694_s8), 8 }
 0x3a3   : > { %s1480_s28 = sshll.u32 %s1566_s8, 7 }
 0x3a4   : > { %s699_s17 = ssub.s32 1024, %s1480_s28 }
 0x3a5   : > { %700 = vsyncadd %s686_s26, %s699_s17  ;;  %p817_p1 = scmp.ne.s32.totalorder %s1480_s28, 0  ;;  %s824_s24 = sshll.u32 %s1240_s16, 10 }
 0x3a6   : > { %s1490_s7 = scalar_lea.hbm %s1542_s3, %s824_s24  ;;  %s705_s4 = sshll.u32 %s1464_s23, 4  ;;  %s1493_s4 = int_to_ptr.vmem [resolvable:$true] %s705_s4 }
 0x3a7   : > { %s1114_s9 = scalar_lea.vmem %s1493_s4, %s1480_s28  ;;  %s1196_s22 = smov [#allocation9]  }
 0x3a8   : > { %p1115_p3 = scmp.ne.s32.totalorder %s1493_s4, %s1114_s9  ;;  %s1118_s10 = sshll.u32 %s1196_s22, 4  ;;  %s1119_s10 = int_to_ptr.vmem [resolvable:$false] %s1118_s10 }
 0x3a9   : > { %s1120_s16 = scalar_lea.vmem %s1119_s10, 2048  ;;  %p1121_p11 = scmp.lt.s32.totalorder %s1493_s4, %s1119_s10 }
 0x3aa   : > { %p1116_p5 = pnand %p1115_p3, %p817_p1  ;;  %p1122_p13 = scmp.lt.s32.totalorder %s1120_s16, %s1114_s9 }
 0x3ac   : > { %p1117_p6 = pneg %p1116_p5  ;;  %p1123_p0 = por %p1122_p13, %p1121_p11 }
 0x3ae   : > { %p1124_p12 = pnand %p1123_p0, %p1117_p6 }
 0x3b0   : > { %1127 = shalt.err (!%p1124_p12)
}
 0x3b1   : > { %s1128_s11 = scalar_lea.hbm %s1490_s7, %s1480_s28  ;;  %s1132_s30 = scalar_lea.hbm %s1542_s3, 1536 }
 0x3b2   : > { %p1129_p7 = scmp.ne.s32.totalorder %s1490_s7, %s1128_s11  ;;  %p1133_p9 = scmp.lt.u32.totalorder %s1490_s7, %s1542_s3 }
 0x3b3   : > { %p1134_p10 = scmp.lt.u32.totalorder %s1132_s30, %s1128_s11  ;;  %p1136_p5 = scmp.lt.u32.totalorder %s1128_s11, %s1490_s7 }
 0x3b4   : > { %p1130_p2 = pnand %p1129_p7, %p817_p1 }
 0x3b5   : > { %p1135_p3 = por %p1134_p10, %p1133_p9 }
 0x3b6   : > { %p1131_p8 = pneg %p1130_p2 }
 0x3b7   : > { %p1137_p6 = por %p1136_p5, %p1135_p3 }
 0x3b9   : > { %p1138_p11 = pnand %p1137_p6, %p1131_p8 }
 0x3bb   : > { %1141 = shalt.err (!%p1138_p11)
}
 0x3bc   : > { %s1197_s8 = smov 128   ;;  %s1198_s17 = smov 8  }
 0x3bd   : > { %711 = dma.vmem_to_hbm [thread:$0]  (%p817_p1), %s1493_s4, %s1480_s28, %s1490_s7, %s686_s26, %s1197_s8, %s1197_s8, %s1198_s17  }
 0x3be PF: > { %s720_s24 = sand.u32 1, %s1172_s12   ;;  %p1558_p13 = scmp.ne.s32.totalorder %s1549_s25, 0 }
 0x3bf   : > { %s721_s5 = scalar_lea.sflag [#allocation5], %s720_s24 }
 0x3c0   : > { %p963_p0 = pnand %p801_p4, %p1558_p13 }
 0x3c2   : > { %1167 = dma.done.wait (!%p963_p0), %s721_s5, 1024  }
 0x3c3   : > { %1169 = vsyncadd (!%p963_p0), %s721_s5, 4294966272  ;;  %p17_p12 = scmp.ge.s32.totalorder %s1244_s18, 4   ;;  %s1559_s12 = smov %s1176_s13 }
 0x3c4   : > { %s1560_s13 = smov %s1180_s14  ;;  %s1561_s14 = smov %s1256_s21 }
 0x3c5   : > { %s1562_s15 = smov %s1244_s18  ;;  %19 = sbr.rel (!%p17_p12) target bundleno = 6 (0x6), region = 85 }
 0x3cc   :  { %726 = vsyncpa [#allocation4], 1 }
 0x3cd   :  { %728 = vsyncpa [#allocation4 + $0x1], 1 }
 0x3ce   :  { %729 = vsyncpa [#allocation7], 1 }
 0x3cf   :  { %730 = vsyncpa [#allocation5], 1 }
 0x3d0   :  { %732 = vsyncpa [#allocation5 + $0x1], 1 }

</bundles_post_ra>
